<compile_context>
chip_gen: v7x
topology: tpu7x:2x2x1
jax: 0.10.0
libtpu: 0.0.40
codegen_flags: <defaults>
</compile_context>

<pallas_src>
import jax
import jax.numpy as jnp
from jax.experimental import pallas as pl
from jax.experimental.pallas import tpu as pltpu


def _round_up(x, m):
    return ((x + m - 1) // m) * m


def _default_tile_and_vmem():
    """Per-generation (tm, vmem_limit_bytes) defaults for the LoRA projection."""
    try:
        kind = jax.devices()[0].device_kind.lower()
    except Exception:  # pragma: no cover - defensive
        kind = ""
    if "v7" in kind or "7x" in kind:
        return 512, 48 << 20          # v7x: 64 MiB physical VMEM, leave headroom
    if "v6" in kind:
        return 1024, 64 << 20         # v6e: big tiles amortize per-step overhead
    if "v5" in kind:
        return 256, 64 << 20          # v5e: 16 MiB default scoped VMEM
    return 256, None                  # unknown: conservative, compiler default


# ----------------------------------------------------------------------------
# Kernel 1: fused LoRA-augmented linear projection
#   xa   = x @ A_pad                               (rank padded to 128 lanes)
#   y    = concat([x, xa]) @ [W ; B_scaled]        (single MXU K-accumulation)
# x tile: [tm, H]  A_pad: [H, Rp]  Wcat: [H+Rp, H]  y tile: [tm, H]
# (lora_dropout=0.05 is train-time only; eval forward has it disabled)
# TODO(synk): the full Qwen2VL transformer stack around this projection is
#             not reproducible here.
# ----------------------------------------------------------------------------
def _lora_linear_kernel(x_ref, a_ref, wcat_ref, o_ref):
    x = x_ref[...]
    xa = jnp.dot(x, a_ref[...], preferred_element_type=jnp.float32)
    xcat = jnp.concatenate([x, xa.astype(x.dtype)], axis=-1)   # [tm, H+Rp]
    y = jnp.dot(xcat, wcat_ref[...], preferred_element_type=jnp.float32)
    o_ref[...] = y.astype(o_ref.dtype)


def _weight_spec(shape, single_buffer):
    """Grid-invariant weight BlockSpec; single-buffered when supported."""
    index_map = lambda i: (0,) * len(shape)
    if single_buffer:
        return pl.BlockSpec(shape, index_map, pipeline_mode=pl.Buffered(1))
    return pl.BlockSpec(shape, index_map)


def lora_linear(x, a_pad, wcat, *, tm=None):
    """x: [M, H]; a_pad: [H, Rp]; wcat: [H+Rp, H] -> [M, H]."""
    M, H = x.shape
    Rp = a_pad.shape[1]
    assert wcat.shape == (H + Rp, H)

    tm_default, vmem_limit = _default_tile_and_vmem()
    if tm is None:
        tm = tm_default

    # Tiny-M guard: keep at least one full 16-row bf16 tile (trivial pad).
    M_eff = M
    if M < 16:
        x = jnp.pad(x, ((0, 16 - M), (0, 0)))
        M_eff = 16

    # Row tile: multiple of 16 (bf16 sublane packing), never bigger than M,
    # and capped near M/2 so a v7x megacore always gets >=2 grid tiles.
    tm = min(tm, _round_up(M_eff, 16))
    tm = max(16, min(tm, _round_up(-(-M_eff // 2), 16)))
    grid_m = pl.cdiv(M_eff, tm)        # ragged last tile handled by Pallas

    cp_kwargs = dict(dimension_semantics=("parallel",))   # megacore on v7x
    if vmem_limit is not None:
        cp_kwargs["vmem_limit_bytes"] = vmem_limit

    def run(single_buffer):
        return pl.pallas_call(
            _lora_linear_kernel,
            out_shape=jax.ShapeDtypeStruct((M_eff, H), x.dtype),
            grid=(grid_m,),
            in_specs=[
                pl.BlockSpec((tm, H), lambda i: (i, 0)),       # x row tiles
                _weight_spec((H, Rp), single_buffer),          # A (resident)
                _weight_spec((H + Rp, H), single_buffer),      # [W; B_scaled]
            ],
            out_specs=pl.BlockSpec((tm, H), lambda i: (i, 0)),
            compiler_params=pltpu.CompilerParams(**cp_kwargs),
        )(x, a_pad, wcat)

    try:
        out = run(True)
    except Exception:
        # Fallback if this JAX build rejects Buffered(1) / pipeline_mode.
        out = run(False)

    return out[:M] if M_eff != M else out


# ----------------------------------------------------------------------------
# Kernel 2: MLP head on last-token hidden state
#   h -> ReLU(h@W1+b1) -> ReLU(@W2+b2) -> @W3+b3
# Tiny (a few MFLOPs): one ungridded all-VMEM call.  Bias-add + ReLU in f32 on
# the MXU accumulator; one bf16 cast per layer.  Output lanes pre-padded to
# 128 (dense stores); logits sliced back to 123 in the wrapper.
# ----------------------------------------------------------------------------
def _mlp_head_kernel(h_ref, w1_ref, b1_ref, w2_ref, b2_ref, w3_ref, b3_ref,
                     o_ref):
    f32 = jnp.float32
    h = h_ref[...]

    z1 = jnp.dot(h, w1_ref[...], preferred_element_type=f32) + b1_ref[...].astype(f32)
    a1 = jnp.maximum(z1, 0.0).astype(h.dtype)

    z2 = jnp.dot(a1, w2_ref[...], preferred_element_type=f32) + b2_ref[...].astype(f32)
    a2 = jnp.maximum(z2, 0.0).astype(h.dtype)

    z3 = jnp.dot(a2, w3_ref[...], preferred_element_type=f32) + b3_ref[...].astype(f32)
    o_ref[...] = z3.astype(o_ref.dtype)


def mlp_head(h, p):
    B, H = h.shape
    MH = p["mlp_w1"].shape[1]
    out_pad = p["mlp_w3"].shape[1]         # already lane-padded to 128
    OUT = p["num_classes"]

    b_pad = _round_up(max(B, 1), 16)       # bf16: 16 sublanes per vreg
    if b_pad != B:
        h = jnp.pad(h, ((0, b_pad - B), (0, 0)))

    full = lambda s: pl.BlockSpec(s, lambda: tuple(0 for _ in s))
    out = pl.pallas_call(
        _mlp_head_kernel,
        out_shape=jax.ShapeDtypeStruct((b_pad, out_pad), h.dtype),
        in_specs=[
            full((b_pad, H)),
            full(p["mlp_w1"].shape), full(p["mlp_b1"].shape),
            full(p["mlp_w2"].shape), full(p["mlp_b2"].shape),
            full(p["mlp_w3"].shape), full(p["mlp_b3"].shape),
        ],
        out_specs=full((b_pad, out_pad)),
    )(h, p["mlp_w1"], p["mlp_b1"], p["mlp_w2"], p["mlp_b2"],
      p["mlp_w3"], p["mlp_b3"])
    return out[:B, :OUT]


# ----------------------------------------------------------------------------
# One-time weight preparation (hoisted out of the hot path):
#   * fold LoRA scaling (alpha/r) into B (frozen weights -> exact)
#   * zero-pad rank 64 -> 128 lanes (and no further)
#   * stack Wcat = [W ; B_scaled] for the fused matmul
#   * lane-pad the 123-wide classifier to 128 for dense stores
# ----------------------------------------------------------------------------
def prepare_params(raw):
    dt = raw["w_base"].dtype
    H, R = raw["lora_a"].shape
    r_pad = _round_up(R, 128)                       # keep Rp = 128, never more

    b_scaled = (jnp.asarray(raw["scaling"], jnp.float32)
                * raw["lora_b"].astype(jnp.float32)).astype(dt)
    a_pad = jnp.pad(raw["lora_a"], ((0, 0), (0, r_pad - R)))
    b_pad = jnp.pad(b_scaled, ((0, r_pad - R), (0, 0)))
    wcat = jnp.concatenate([raw["w_base"], b_pad], axis=0)     # [H+Rp, H]

    OUT = raw["mlp_w3"].shape[1]
    out_pad = _round_up(OUT, 128)
    w3 = jnp.pad(raw["mlp_w3"], ((0, 0), (0, out_pad - OUT)))
    b3 = jnp.pad(raw["mlp_b3"], ((0, 0), (0, out_pad - OUT)))

    return {
        "a_pad": a_pad, "wcat": wcat,
        "mlp_w1": raw["mlp_w1"], "mlp_b1": raw["mlp_b1"],
        "mlp_w2": raw["mlp_w2"], "mlp_b2": raw["mlp_b2"],
        "mlp_w3": w3, "mlp_b3": b3,
        "num_classes": OUT,
    }


# ----------------------------------------------------------------------------
# Forward: LoRA projection over all tokens (stand-in for the q/k/v/o adapter
# projections inside the backbone), then the classification MLP head on the
# last token, matching `self.mlp(lora_output.hidden_states[:, -1])`.
# ----------------------------------------------------------------------------
def lora_with_mlp_forward(inputs_embeds, prepped):
    B, S, H = inputs_embeds.shape
    x2d = inputs_embeds.reshape(B * S, H)
    hidden = lora_linear(x2d, prepped["a_pad"], prepped["wcat"])
    last_tok = hidden.reshape(B, S, H)[:, -1]
    return mlp_head(last_tok, prepped)


# ----------------------------------------------------------------------------
# Pure-jnp reference (mirrors the kernel's bf16/f32 casting) for a sanity check.
# ----------------------------------------------------------------------------
def _reference_forward(inputs_embeds, raw):
    f32 = jnp.float32
    B, S, H = inputs_embeds.shape
    x = inputs_embeds.reshape(B * S, H)
    xa = jnp.dot(x.astype(f32), raw["lora_a"].astype(f32)).astype(x.dtype)
    base = jnp.dot(x.astype(f32), raw["w_base"].astype(f32))
    lora = jnp.dot(xa.astype(f32), raw["scaling"] * raw["lora_b"].astype(f32))
    hidden = (base + lora).astype(x.dtype).reshape(B, S, H)
    h = hidden[:, -1]

    def lin(a, w, b):
        return jnp.dot(a.astype(f32), w.astype(f32)) + b.astype(f32)

    a1 = jnp.maximum(lin(h, raw["mlp_w1"], raw["mlp_b1"]), 0.0).astype(h.dtype)
    a2 = jnp.maximum(lin(a1, raw["mlp_w2"], raw["mlp_b2"]), 0.0).astype(h.dtype)
    return lin(a2, raw["mlp_w3"], raw["mlp_b3"]).astype(h.dtype)


if __name__ == "__main__":
    # Small shapes standing in for Qwen2-VL-2B (hidden_size=1536, r=64,
    # mlp_hidden=512, num_classes=123).
    B, S, H = 2, 8, 128
    R = 64                       # LoRA rank (module uses r=64)
    ALPHA = 16                   # lora_alpha
    MLP_H = 128                  # stand-in for mlp_hidden_size=512
    OUT = 123                    # final classifier width (exact)
    DT = jnp.bfloat16

    key = jax.random.PRNGKey(0)
    ks = jax.random.split(key, 10)

    inputs_embeds = jax.random.normal(ks[0], (B, S, H),
                                      dtype=jnp.float32).astype(DT)

    raw_params = {
        # base (frozen) projection weight, [in, out]
        "w_base": (jax.random.normal(ks[1], (H, H)) * 0.05).astype(DT),
        # LoRA adapters (PEFT inits B to zero; small random here so the
        # LoRA path actually exercises the kernel)
        "lora_a": (jax.random.normal(ks[2], (H, R)) * 0.05).astype(DT),
        "lora_b": (jax.random.normal(ks[3], (R, H)) * 0.05).astype(DT),
        "scaling": float(ALPHA) / float(R),      # 16 / 64 = 0.25
        # MLP head (weights stored [in, out]; biases as [1, out])
        "mlp_w1": (jax.random.normal(ks[4], (H, MLP_H)) * 0.05).astype(DT),
        "mlp_b1": jnp.zeros((1, MLP_H), DT),
        "mlp_w2": (jax.random.normal(ks[5], (MLP_H, MLP_H)) * 0.05).astype(DT),
        "mlp_b2": jnp.zeros((1, MLP_H), DT),
        "mlp_w3": (jax.random.normal(ks[6], (MLP_H, OUT)) * 0.05).astype(DT),
        "mlp_b3": jnp.zeros((1, OUT), DT),
    }

    prepped = prepare_params(raw_params)          # one-time load/init work
    out = lora_with_mlp_forward(inputs_embeds, prepped)
    out = jax.block_until_ready(out)

    assert out.shape == (B, OUT) and out.dtype == DT

    ref = _reference_forward(inputs_embeds, raw_params)
    assert jnp.allclose(out.astype(jnp.float32), ref.astype(jnp.float32),
                        atol=0.1, rtol=0.1)
    print("KERNEL_OK")
</pallas_src>

<mosaic_0001>
module attributes {stable_mosaic.version = 11 : i64} {
  func.func @_lora_linear_kernel(%arg0: i32, %arg1: memref<16x128xbf16, #tpu.memory_space<vmem>>, %arg2: memref<128x128xbf16, #tpu.memory_space<vmem>>, %arg3: memref<256x128xbf16, #tpu.memory_space<vmem>>, %arg4: memref<16x128xbf16, #tpu.memory_space<vmem>>) attributes {dimension_semantics = [#tpu.dimension_semantics<parallel>], iteration_bounds = array<i64: 1>, scalar_prefetch = 0 : i64, scratch_operands = 0 : i64, tpu.core_type = #tpu.core_type<tc>, window_params = [{transform_indices = @transform_0, window_bounds = array<i64: 16, 128>}, {pipeline_mode = #tpu.pipeline_mode<synchronous>, transform_indices = @transform_1, window_bounds = array<i64: 128, 128>}, {pipeline_mode = #tpu.pipeline_mode<synchronous>, transform_indices = @transform_2, window_bounds = array<i64: 256, 128>}, {transform_indices = @transform_3, window_bounds = array<i64: 16, 128>}]} {
    %c0 = arith.constant 0 : index
    %c0_0 = arith.constant 0 : index
    %0 = vector.load %arg1[%c0, %c0_0] : memref<16x128xbf16, #tpu.memory_space<vmem>>, vector<16x128xbf16>
    %c0_1 = arith.constant 0 : index
    %c0_2 = arith.constant 0 : index
    %1 = vector.load %arg2[%c0_1, %c0_2] : memref<128x128xbf16, #tpu.memory_space<vmem>>, vector<128x128xbf16>
    %cst = arith.constant dense<0.000000e+00> : vector<16x128xf32>
    %2 = tpu.matmul %0, %1, %cst {dimension_numbers = #tpu.dot_dimension_numbers<[1], [0], [0], [1], [0, 0, 1, 1], [], []>} : vector<16x128xbf16>, vector<128x128xbf16>, vector<16x128xf32> -> vector<16x128xf32>
    %3 = arith.truncf %2 : vector<16x128xf32> to vector<16x128xbf16>
    %4 = tpu.concatenate %0, %3 in 1 : vector<16x128xbf16>, vector<16x128xbf16> -> vector<16x256xbf16>
    %c0_3 = arith.constant 0 : index
    %c0_4 = arith.constant 0 : index
    %5 = vector.load %arg3[%c0_3, %c0_4] : memref<256x128xbf16, #tpu.memory_space<vmem>>, vector<256x128xbf16>
    %cst_5 = arith.constant dense<0.000000e+00> : vector<16x128xf32>
    %6 = tpu.matmul %4, %5, %cst_5 {dimension_numbers = #tpu.dot_dimension_numbers<[1], [0], [0], [1], [0, 0, 1, 1], [], []>} : vector<16x256xbf16>, vector<256x128xbf16>, vector<16x128xf32> -> vector<16x128xf32>
    %7 = arith.truncf %6 : vector<16x128xf32> to vector<16x128xbf16>
    %c0_6 = arith.constant 0 : index
    %c0_7 = arith.constant 0 : index
    %8 = vector.load %arg4[%c0_6, %c0_7] : memref<16x128xbf16, #tpu.memory_space<vmem>>, vector<16x128xbf16>
    tpu.vector_store %arg4[%c0_6, %c0_7], %7 {strides = array<i32>} : memref<16x128xbf16, #tpu.memory_space<vmem>>, vector<16x128xbf16>,
    return
  }
  func.func @transform_0(%arg0: i32) -> (i32, i32) {
    %c0_i32 = arith.constant 0 : i32
    %c0_i32_0 = arith.constant 0 : i32
    return %arg0, %c0_i32 : i32, i32
  }
  func.func @transform_1(%arg0: i32) -> (i32, i32) {
    %c0_i32 = arith.constant 0 : i32
    %c0_i32_0 = arith.constant 0 : i32
    %c0_i32_1 = arith.constant 0 : i32
    return %c0_i32, %c0_i32_0 : i32, i32
  }
  func.func @transform_2(%arg0: i32) -> (i32, i32) {
    %c0_i32 = arith.constant 0 : i32
    %c0_i32_0 = arith.constant 0 : i32
    %c0_i32_1 = arith.constant 0 : i32
    return %c0_i32, %c0_i32_0 : i32, i32
  }
  func.func @transform_3(%arg0: i32) -> (i32, i32) {
    %c0_i32 = arith.constant 0 : i32
    %c0_i32_0 = arith.constant 0 : i32
    return %arg0, %c0_i32 : i32, i32
  }
}

module attributes {stable_mosaic.version = 11 : i64} {
  func.func @_lora_linear_kernel(%arg0: i32, %arg1: memref<16x128xbf16, #tpu.memory_space<vmem>>, %arg2: memref<128x128xbf16, #tpu.memory_space<vmem>>, %arg3: memref<256x128xbf16, #tpu.memory_space<vmem>>, %arg4: memref<16x128xbf16, #tpu.memory_space<vmem>>) attributes {dimension_semantics = [#tpu.dimension_semantics<parallel>], iteration_bounds = array<i64: 1>, scalar_prefetch = 0 : i64, scratch_operands = 0 : i64, tpu.core_type = #tpu.core_type<tc>, window_params = [{transform_indices = @transform_0, window_bounds = array<i64: 16, 128>}, {pipeline_mode = #tpu.pipeline_mode<synchronous>, transform_indices = @transform_1, window_bounds = array<i64: 128, 128>}, {pipeline_mode = #tpu.pipeline_mode<synchronous>, transform_indices = @transform_2, window_bounds = array<i64: 256, 128>}, {transform_indices = @transform_3, window_bounds = array<i64: 16, 128>}]} {
    %c0 = arith.constant 0 : index
    %c0_0 = arith.constant 0 : index
    %0 = vector.load %arg1[%c0, %c0_0] : memref<16x128xbf16, #tpu.memory_space<vmem>>, vector<16x128xbf16>
    %c0_1 = arith.constant 0 : index
    %c0_2 = arith.constant 0 : index
    %1 = vector.load %arg2[%c0_1, %c0_2] : memref<128x128xbf16, #tpu.memory_space<vmem>>, vector<128x128xbf16>
    %cst = arith.constant dense<0.000000e+00> : vector<16x128xf32>
    %2 = tpu.matmul %0, %1, %cst {dimension_numbers = #tpu.dot_dimension_numbers<[1], [0], [0], [1], [0, 0, 1, 1], [], []>} : vector<16x128xbf16>, vector<128x128xbf16>, vector<16x128xf32> -> vector<16x128xf32>
    %3 = arith.truncf %2 : vector<16x128xf32> to vector<16x128xbf16>
    %4 = tpu.concatenate %0, %3 in 1 : vector<16x128xbf16>, vector<16x128xbf16> -> vector<16x256xbf16>
    %c0_3 = arith.constant 0 : index
    %c0_4 = arith.constant 0 : index
    %5 = vector.load %arg3[%c0_3, %c0_4] : memref<256x128xbf16, #tpu.memory_space<vmem>>, vector<256x128xbf16>
    %cst_5 = arith.constant dense<0.000000e+00> : vector<16x128xf32>
    %6 = tpu.matmul %4, %5, %cst_5 {dimension_numbers = #tpu.dot_dimension_numbers<[1], [0], [0], [1], [0, 0, 1, 1], [], []>} : vector<16x256xbf16>, vector<256x128xbf16>, vector<16x128xf32> -> vector<16x128xf32>
    %7 = arith.truncf %6 : vector<16x128xf32> to vector<16x128xbf16>
    %c0_6 = arith.constant 0 : index
    %c0_7 = arith.constant 0 : index
    %8 = vector.load %arg4[%c0_6, %c0_7] : memref<16x128xbf16, #tpu.memory_space<vmem>>, vector<16x128xbf16>
    tpu.vector_store %arg4[%c0_6, %c0_7], %7 {strides = array<i32>} : memref<16x128xbf16, #tpu.memory_space<vmem>>, vector<16x128xbf16>,
    return
  }
  func.func @transform_0(%arg0: i32) -> (i32, i32) {
    %c0_i32 = arith.constant 0 : i32
    %c0_i32_0 = arith.constant 0 : i32
    return %arg0, %c0_i32 : i32, i32
  }
  func.func @transform_1(%arg0: i32) -> (i32, i32) {
    %c0_i32 = arith.constant 0 : i32
    %c0_i32_0 = arith.constant 0 : i32
    %c0_i32_1 = arith.constant 0 : i32
    return %c0_i32, %c0_i32_0 : i32, i32
  }
  func.func @transform_2(%arg0: i32) -> (i32, i32) {
    %c0_i32 = arith.constant 0 : i32
    %c0_i32_0 = arith.constant 0 : i32
    %c0_i32_1 = arith.constant 0 : i32
    return %c0_i32, %c0_i32_0 : i32, i32
  }
  func.func @transform_3(%arg0: i32) -> (i32, i32) {
    %c0_i32 = arith.constant 0 : i32
    %c0_i32_0 = arith.constant 0 : i32
    return %arg0, %c0_i32 : i32, i32
  }
}

</mosaic_0001>

<bundles_post_ra>
// kernel: tpu_custom_call.1
= control target key start
LH: loop header
LB: loop body
LE: loop exit
PB: predicated region body
PF: predicated region fallthrough
CT: control target
= control target key end

     0   :  { %8 = vsyncpa [#allocation3], 0  ;;  %s675_s0 = inlined_call_operand.hbm [shape: bf16[16,128], index: 0, kind: input, shape index: {}]   ;;  %s676_s1 = inlined_call_operand.hbm [shape: bf16[128,128], index: 1, kind: input, shape index: {}]   ;;  %s677_s2 = inlined_call_operand.hbm [shape: bf16[256,128], index: 2, kind: input, shape index: {}]   ;;  %s678_s3 = inlined_call_operand.hbm [shape: bf16[16,128], index: 3, kind: output, shape index: {}]  }
   0x1   :  { %9 = vsyncpa [#allocation6], 0 }
   0x2   :  { %10 = vsyncpa [#allocation4], 0  ;;  %s580_s12 = smov [#allocation5]   ;;  %s581_s14 = smov [#allocation2]  }
   0x3   :  { %s28_s13 = sshll.u32 %s580_s12, 4  ;;  %s16_s15 = sshll.u32 %s581_s14, 4  ;;  %s29_s13 = int_to_ptr.vmem [resolvable:$true] %s28_s13  ;;  %s608_s15 = int_to_ptr.vmem [resolvable:$true] %s16_s15 }
   0x4   :  { %s486_s18 = scalar_lea.hbm %s676_s1, 1024 }
   0x5   :  { %p487_p0 = scmp.ne.s32.totalorder %s676_s1, %s486_s18  ;;  %p490_p1 = scmp.lt.u32.totalorder %s486_s18, %s676_s1 }
   0x7   :  { %p492_p2 = pnand %p490_p1, %p487_p0 }
   0x9   :  { %495 = shalt.err (!%p492_p2)
}
   0xa   :  { %s496_s23 = scalar_lea.vmem %s29_s13, 1024  ;;  %p501_p4 = scmp.lt.s32.totalorder %s29_s13, %s29_s13 }
   0xb   :  { %p497_p3 = scmp.ne.s32.totalorder %s29_s13, %s496_s23  ;;  %p502_p5 = scmp.lt.s32.totalorder %s496_s23, %s496_s23 }
   0xd   :  { %p503_p6 = por %p502_p5, %p501_p4 }
   0xf   :  { %p504_p7 = pnand %p503_p6, %p497_p3 }
  0x11   :  { %507 = shalt.err (!%p504_p7)
}
  0x12   :  { %s582_s24 = smov 64   ;;  %s583_s25 = smov 4  }
  0x13   :  { %34 = dma.hbm_to_vmem [thread:$0]  %s676_s1, 1024, %s29_s13, [#allocation6], %s582_s24, %s582_s24, %s583_s25  }
  0x14   :  { %s508_s30 = scalar_lea.hbm %s675_s0, 128 }
  0x15   :  { %p509_p8 = scmp.ne.s32.totalorder %s675_s0, %s508_s30  ;;  %p512_p9 = scmp.lt.u32.totalorder %s508_s30, %s675_s0 }
  0x17   :  { %p514_p10 = pnand %p512_p9, %p509_p8 }
  0x19   :  { %517 = shalt.err (!%p514_p10)
}
  0x1a   :  { %s518_s8 = scalar_lea.vmem %s608_s15, 128  ;;  %p523_p12 = scmp.lt.s32.totalorder %s608_s15, %s608_s15 }
  0x1b   :  { %p519_p11 = scmp.ne.s32.totalorder %s608_s15, %s518_s8  ;;  %p524_p13 = scmp.lt.s32.totalorder %s518_s8, %s518_s8 }
  0x1d   :  { %p525_p0 = por %p524_p13, %p523_p12 }
  0x1f   :  { %p526_p1 = pnand %p525_p0, %p519_p11 }
  0x21   :  { %529 = shalt.err (!%p526_p1)
}
  0x22   :  { %22 = dma.hbm_to_vmem [thread:$0]  %s675_s0, 128, %s608_s15, [#allocation3], %s582_s24, %s582_s24, %s583_s25  }
  0x23   :  { %s584_s10 = smov [#allocation7]   ;;  %s530_s14 = scalar_lea.hbm %s677_s2, 2048 }
  0x24   :  { %s40_s11 = sshll.u32 %s584_s10, 4  ;;  %p531_p2 = scmp.ne.s32.totalorder %s677_s2, %s530_s14  ;;  %s41_s11 = int_to_ptr.vmem [resolvable:$true] %s40_s11 }
  0x25   :  { %p534_p3 = scmp.lt.u32.totalorder %s530_s14, %s677_s2 }
  0x27   :  { %p536_p4 = pnand %p534_p3, %p531_p2 }
  0x29   :  { %539 = shalt.err (!%p536_p4)
}
  0x2a   :  { %s540_s20 = scalar_lea.vmem %s41_s11, 2048  ;;  %p545_p6 = scmp.lt.s32.totalorder %s41_s11, %s41_s11 }
  0x2b   :  { %p541_p5 = scmp.ne.s32.totalorder %s41_s11, %s540_s20  ;;  %p546_p7 = scmp.lt.s32.totalorder %s540_s20, %s540_s20 }
  0x2d   :  { %p547_p8 = por %p546_p7, %p545_p6 }
  0x2f   :  { %p548_p9 = pnand %p547_p8, %p541_p5 }
  0x31   :  { %551 = shalt.err (!%p548_p9)
}
  0x32   :  { %46 = dma.hbm_to_vmem [thread:$0]  %s677_s2, 2048, %s41_s11, [#allocation6], %s582_s24, %s582_s24, %s583_s25  }
  0x33   :  { %574 = dma.done.wait [#allocation3], 128  }
  0x34   :  { %575 = vsyncadd [#allocation3], 4294967168 }
  0x35   :  { %576 = dma.done.wait [#allocation6], 3072  }
  0x36   :  { %577 = vsyncadd [#allocation6], 4294964224  ;;  %v585_v0 = vmov 0.0   ;;  %vm586_vm0 = vmmov 0   ;;  %v461_v1 = vld [vmem:[#allocation5] sm:$0xff]   ;;  %v462_v2 = vld [vmem:[#allocation5 + $0x8] sm:$0xff]  }
  0x37   :  { %433 = vmatprep.subr.bf16.mxu0 %v585_v0  ;;  %449 = vmatprep.mubr.msk.bf16.mxu0 %vm586_vm0, %v585_v0  ;;  %v463_v3 = vld [vmem:[#allocation5 + $0x10] sm:$0xff]   ;;  %v464_v4 = vld [vmem:[#allocation5 + $0x18] sm:$0xff]   ;;  %v470_v5 = vld [vmem:[#allocation7 + $0x40] sm:$0xff]   ;;  %s587_s2 = smov [#allocation8]  }
  0x38   :  { %434 = vmatpush3.bf16.msra.mxu0 %v461_v1  ;;  %v471_v6 = vld [vmem:[#allocation7] sm:$0xff]   ;;  %411 = vmatprep.subr.bf16.mxu1 %v470_v5  ;;  %v472_v7 = vld [vmem:[#allocation7 + $0x48] sm:$0xff]   ;;  %v474_v9 = vld [vmem:[#allocation7 + $0x50] sm:$0xff]   ;;  %s355_s21 = sshll.u32 %s587_s2, 4  ;;  %s356_s21 = int_to_ptr.vmem [resolvable:$true] %s355_s21 }
  0x39   :  { %435 = vmatprep.subr.bf16.mxu0 %v585_v0  ;;  %412 = vmatpush3.bf16.msra.mxu1 %v471_v6  ;;  %v473_v8 = vld [vmem:[#allocation7 + $0x8] sm:$0xff]   ;;  %v465_v10 = vld [vmem:[#allocation5 + $0x20] sm:$0xff]   ;;  %v475_v11 = vld [vmem:[#allocation7 + $0x10] sm:$0xff]   ;;  %s552_s22 = scalar_lea.vmem %s356_s21, 128  ;;  %p557_p11 = scmp.lt.s32.totalorder %s356_s21, %s356_s21 }
  0x3a   :  { %413 = vmatprep.subr.bf16.mxu1 %v472_v7  ;;  %v476_v12 = vld [vmem:[#allocation7 + $0x58] sm:$0xff]   ;;  %v466_v13 = vld [vmem:[#allocation5 + $0x28] sm:$0xff]   ;;  %v478_v15 = vld [vmem:[#allocation7 + $0x60] sm:$0xff]   ;;  %p553_p10 = scmp.ne.s32.totalorder %s356_s21, %s552_s22  ;;  %p558_p12 = scmp.lt.s32.totalorder %s552_s22, %s552_s22 }
  0x3b   :  { %v477_v14 = vld [vmem:[#allocation7 + $0x18] sm:$0xff]   ;;  %v467_v16 = vld [vmem:[#allocation5 + $0x30] sm:$0xff]   ;;  %v479_v17 = vld [vmem:[#allocation7 + $0x20] sm:$0xff]  }
  0x3c   :  { %436 = vmatpush3.bf16.msra.mxu0 %v462_v2  ;;  %v480_v18 = vld [vmem:[#allocation7 + $0x68] sm:$0xff]   ;;  %v468_v19 = vld [vmem:[#allocation5 + $0x38] sm:$0xff]   ;;  %v482_v22 = vld [vmem:[#allocation7 + $0x70] sm:$0xff]   ;;  %p559_p13 = por %p558_p12, %p557_p11 }
  0x3d   :  { %437 = vmatprep.subr.bf16.mxu0 %v585_v0  ;;  %414 = vmatpush3.bf16.msra.mxu1 %v473_v8  ;;  %v481_v20 = vld [vmem:[#allocation7 + $0x28] sm:$0xff]   ;;  %v469_v21 = vld [vmem:[#allocation2] sm:$0xff]   ;;  %v483_v23 = vld [vmem:[#allocation7 + $0x30] sm:$0xff]  }
  0x3e   :  { %415 = vmatprep.subr.bf16.mxu1 %v474_v9  ;;  %v484_v24 = vld [vmem:[#allocation7 + $0x78] sm:$0xff]   ;;  %p560_p0 = pnand %p559_p13, %p553_p10 }
  0x3f   :  { %v485_v25 = vld [vmem:[#allocation7 + $0x38] sm:$0xff]  }
  0x40   :  { %438 = vmatpush3.bf16.msra.mxu0 %v463_v3 }
  0x41   :  { %439 = vmatprep.subr.bf16.mxu0 %v585_v0  ;;  %416 = vmatpush3.bf16.msra.mxu1 %v475_v11 }
  0x42   :  { %417 = vmatprep.subr.bf16.mxu1 %v476_v12 }
  0x44   :  { %440 = vmatpush3.bf16.msra.mxu0 %v464_v4 }
  0x45   :  { %441 = vmatprep.subr.bf16.mxu0 %v585_v0  ;;  %418 = vmatpush3.bf16.msra.mxu1 %v477_v14 }
  0x46   :  { %419 = vmatprep.subr.bf16.mxu1 %v478_v15 }
  0x48   :  { %442 = vmatpush3.bf16.msra.mxu0 %v465_v10 }
  0x49   :  { %443 = vmatprep.subr.bf16.mxu0 %v585_v0  ;;  %420 = vmatpush3.bf16.msra.mxu1 %v479_v17 }
  0x4a   :  { %421 = vmatprep.subr.bf16.mxu1 %v480_v18 }
  0x4c   :  { %444 = vmatpush3.bf16.msra.mxu0 %v466_v13 }
  0x4d   :  { %445 = vmatprep.subr.bf16.mxu0 %v585_v0  ;;  %422 = vmatpush3.bf16.msra.mxu1 %v481_v20 }
  0x4e   :  { %423 = vmatprep.subr.bf16.mxu1 %v482_v22 }
  0x50   :  { %446 = vmatpush3.bf16.msra.mxu0 %v467_v16 }
  0x51   :  { %447 = vmatprep.subr.bf16.mxu0 %v585_v0  ;;  %424 = vmatpush3.bf16.msra.mxu1 %v483_v23 }
  0x52   :  { %425 = vmatprep.subr.bf16.mxu1 %v484_v24 }
  0x54   :  { %448 = vmatpush3.bf16.msra.mxu0 %v468_v19 }
  0x55   :  { %426 = vmatpush3.bf16.msra.mxu1 %v485_v25 }
  0x57   :  { %450 = vmatmul.mubr.bf16.vlgmr.msra.gmra.mrb[0].mxu0 %v469_v21 }
 0x12a   :  { %v163_v26 = vpop.f32.mrb[0].mxu0 }
 0x12b   :  { %v451_v27 = vpop.f32.mrb[1].mxu0 }
 0x12c   :  { %v166_v28 = vpop.f32.mrb[2].mxu0 }
 0x12d   :  { %v452_v29 = vpop.f32.mrb[3].mxu0  ;;  %v170_v30 = vpack.c.bf16 %v166_v28, %v163_v26 }
 0x12f   :  { %331 = vmatprep.mubr.bf16.mxu1 %v170_v30 }
 0x130   :  { %332 = vmatmul.mubr.bf16.vlgmr.msra.gmra.mrb[0].mxu1 %v469_v21 }
 0x203   :  { %v427_v31 = vpop.f32.mrb[0].mxu1 }
 0x204   :  { %v428_v32 = vpop.f32.mrb[1].mxu1 }
 0x205   :  { %v429_v33 = vadd.f32 %v428_v32, %v427_v31  ;;  %v430_v34 = vpop.f32.mrb[2].mxu1 }
 0x206   :  { %v431_v35 = vpop.f32.mrb[3].mxu1 }
 0x207   :  { %v432_v36 = vadd.f32 %v431_v35, %v430_v34 }
 0x209   :  { %v400_v37 = vpack.c.bf16 %v432_v36, %v429_v33 }
 0x20b   :  { %401 = vst [vmem:[#allocation8] sm:$0xff] %v400_v37  }
 0x20c   :  { %563 = shalt.err (!%p560_p0)
}
 0x20d   :  { %s564_s27 = scalar_lea.hbm %s678_s3, 128 }
 0x20e   :  { %p565_p1 = scmp.ne.s32.totalorder %s678_s3, %s564_s27  ;;  %p568_p2 = scmp.lt.u32.totalorder %s564_s27, %s678_s3 }
 0x210   :  { %p570_p3 = pnand %p568_p2, %p565_p1 }
 0x212   :  { %573 = shalt.err (!%p570_p3)
}
 0x213   :  { %361 = dma.vmem_to_hbm [thread:$0]  %s356_s21, 128, %s678_s3, [#allocation4], %s582_s24, %s582_s24, %s583_s25  }
 0x214   :  { %578 = dma.done.wait [#allocation4], 128  }
 0x215   :  { %579 = vsyncadd [#allocation4], 4294967168 }
 0x216   :  { %365 = vsyncpa [#allocation3], 1 }
 0x217   :  { %366 = vsyncpa [#allocation6], 1 }
 0x218   :  { %367 = vsyncpa [#allocation4], 1 }

// kernel: tpu_custom_call.1
= control target key start
LH: loop header
LB: loop body
LE: loop exit
PB: predicated region body
PF: predicated region fallthrough
CT: control target
= control target key end

     0   :  { %8 = vsyncpa [#allocation3], 0  ;;  %s675_s0 = inlined_call_operand.hbm [shape: bf16[16,128], index: 0, kind: input, shape index: {}]   ;;  %s676_s1 = inlined_call_operand.hbm [shape: bf16[128,128], index: 1, kind: input, shape index: {}]   ;;  %s677_s2 = inlined_call_operand.hbm [shape: bf16[256,128], index: 2, kind: input, shape index: {}]   ;;  %s678_s3 = inlined_call_operand.hbm [shape: bf16[16,128], index: 3, kind: output, shape index: {}]  }
   0x1   :  { %9 = vsyncpa [#allocation6], 0 }
   0x2   :  { %10 = vsyncpa [#allocation4], 0  ;;  %s580_s12 = smov [#allocation5]   ;;  %s581_s14 = smov [#allocation2]  }
   0x3   :  { %s28_s13 = sshll.u32 %s580_s12, 4  ;;  %s16_s15 = sshll.u32 %s581_s14, 4  ;;  %s29_s13 = int_to_ptr.vmem [resolvable:$true] %s28_s13  ;;  %s608_s15 = int_to_ptr.vmem [resolvable:$true] %s16_s15 }
   0x4   :  { %s486_s18 = scalar_lea.hbm %s676_s1, 1024 }
   0x5   :  { %p487_p0 = scmp.ne.s32.totalorder %s676_s1, %s486_s18  ;;  %p490_p1 = scmp.lt.u32.totalorder %s486_s18, %s676_s1 }
   0x7   :  { %p492_p2 = pnand %p490_p1, %p487_p0 }
   0x9   :  { %495 = shalt.err (!%p492_p2)
}
   0xa   :  { %s496_s23 = scalar_lea.vmem %s29_s13, 1024  ;;  %p501_p4 = scmp.lt.s32.totalorder %s29_s13, %s29_s13 }
   0xb   :  { %p497_p3 = scmp.ne.s32.totalorder %s29_s13, %s496_s23  ;;  %p502_p5 = scmp.lt.s32.totalorder %s496_s23, %s496_s23 }
   0xd   :  { %p503_p6 = por %p502_p5, %p501_p4 }
   0xf   :  { %p504_p7 = pnand %p503_p6, %p497_p3 }
  0x11   :  { %507 = shalt.err (!%p504_p7)
}
  0x12   :  { %s582_s24 = smov 64   ;;  %s583_s25 = smov 4  }
  0x13   :  { %34 = dma.hbm_to_vmem [thread:$0]  %s676_s1, 1024, %s29_s13, [#allocation6], %s582_s24, %s582_s24, %s583_s25  }
  0x14   :  { %s508_s30 = scalar_lea.hbm %s675_s0, 128 }
  0x15   :  { %p509_p8 = scmp.ne.s32.totalorder %s675_s0, %s508_s30  ;;  %p512_p9 = scmp.lt.u32.totalorder %s508_s30, %s675_s0 }
  0x17   :  { %p514_p10 = pnand %p512_p9, %p509_p8 }
  0x19   :  { %517 = shalt.err (!%p514_p10)
}
  0x1a   :  { %s518_s8 = scalar_lea.vmem %s608_s15, 128  ;;  %p523_p12 = scmp.lt.s32.totalorder %s608_s15, %s608_s15 }
  0x1b   :  { %p519_p11 = scmp.ne.s32.totalorder %s608_s15, %s518_s8  ;;  %p524_p13 = scmp.lt.s32.totalorder %s518_s8, %s518_s8 }
  0x1d   :  { %p525_p0 = por %p524_p13, %p523_p12 }
  0x1f   :  { %p526_p1 = pnand %p525_p0, %p519_p11 }
  0x21   :  { %529 = shalt.err (!%p526_p1)
}
  0x22   :  { %22 = dma.hbm_to_vmem [thread:$0]  %s675_s0, 128, %s608_s15, [#allocation3], %s582_s24, %s582_s24, %s583_s25  }
  0x23   :  { %s584_s10 = smov [#allocation7]   ;;  %s530_s14 = scalar_lea.hbm %s677_s2, 2048 }
  0x24   :  { %s40_s11 = sshll.u32 %s584_s10, 4  ;;  %p531_p2 = scmp.ne.s32.totalorder %s677_s2, %s530_s14  ;;  %s41_s11 = int_to_ptr.vmem [resolvable:$true] %s40_s11 }
  0x25   :  { %p534_p3 = scmp.lt.u32.totalorder %s530_s14, %s677_s2 }
  0x27   :  { %p536_p4 = pnand %p534_p3, %p531_p2 }
  0x29   :  { %539 = shalt.err (!%p536_p4)
}
  0x2a   :  { %s540_s20 = scalar_lea.vmem %s41_s11, 2048  ;;  %p545_p6 = scmp.lt.s32.totalorder %s41_s11, %s41_s11 }
  0x2b   :  { %p541_p5 = scmp.ne.s32.totalorder %s41_s11, %s540_s20  ;;  %p546_p7 = scmp.lt.s32.totalorder %s540_s20, %s540_s20 }
  0x2d   :  { %p547_p8 = por %p546_p7, %p545_p6 }
  0x2f   :  { %p548_p9 = pnand %p547_p8, %p541_p5 }
  0x31   :  { %551 = shalt.err (!%p548_p9)
}
  0x32   :  { %46 = dma.hbm_to_vmem [thread:$0]  %s677_s2, 2048, %s41_s11, [#allocation6], %s582_s24, %s582_s24, %s583_s25  }
  0x33   :  { %574 = dma.done.wait [#allocation3], 128  }
  0x34   :  { %575 = vsyncadd [#allocation3], 4294967168 }
  0x35   :  { %576 = dma.done.wait [#allocation6], 3072  }
  0x36   :  { %577 = vsyncadd [#allocation6], 4294964224  ;;  %v585_v0 = vmov 0.0   ;;  %vm586_vm0 = vmmov 0   ;;  %v461_v1 = vld [vmem:[#allocation5] sm:$0xff]   ;;  %v462_v2 = vld [vmem:[#allocation5 + $0x8] sm:$0xff]  }
  0x37   :  { %433 = vmatprep.subr.bf16.mxu0 %v585_v0  ;;  %449 = vmatprep.mubr.msk.bf16.mxu0 %vm586_vm0, %v585_v0  ;;  %v463_v3 = vld [vmem:[#allocation5 + $0x10] sm:$0xff]   ;;  %v464_v4 = vld [vmem:[#allocation5 + $0x18] sm:$0xff]   ;;  %v470_v5 = vld [vmem:[#allocation7 + $0x40] sm:$0xff]   ;;  %s587_s2 = smov [#allocation8]  }
  0x38   :  { %434 = vmatpush3.bf16.msra.mxu0 %v461_v1  ;;  %v471_v6 = vld [vmem:[#allocation7] sm:$0xff]   ;;  %411 = vmatprep.subr.bf16.mxu1 %v470_v5  ;;  %v472_v7 = vld [vmem:[#allocation7 + $0x48] sm:$0xff]   ;;  %v474_v9 = vld [vmem:[#allocation7 + $0x50] sm:$0xff]   ;;  %s355_s21 = sshll.u32 %s587_s2, 4  ;;  %s356_s21 = int_to_ptr.vmem [resolvable:$true] %s355_s21 }
  0x39   :  { %435 = vmatprep.subr.bf16.mxu0 %v585_v0  ;;  %412 = vmatpush3.bf16.msra.mxu1 %v471_v6  ;;  %v473_v8 = vld [vmem:[#allocation7 + $0x8] sm:$0xff]   ;;  %v465_v10 = vld [vmem:[#allocation5 + $0x20] sm:$0xff]   ;;  %v475_v11 = vld [vmem:[#allocation7 + $0x10] sm:$0xff]   ;;  %s552_s22 = scalar_lea.vmem %s356_s21, 128  ;;  %p557_p11 = scmp.lt.s32.totalorder %s356_s21, %s356_s21 }
  0x3a   :  { %413 = vmatprep.subr.bf16.mxu1 %v472_v7  ;;  %v476_v12 = vld [vmem:[#allocation7 + $0x58] sm:$0xff]   ;;  %v466_v13 = vld [vmem:[#allocation5 + $0x28] sm:$0xff]   ;;  %v478_v15 = vld [vmem:[#allocation7 + $0x60] sm:$0xff]   ;;  %p553_p10 = scmp.ne.s32.totalorder %s356_s21, %s552_s22  ;;  %p558_p12 = scmp.lt.s32.totalorder %s552_s22, %s552_s22 }
  0x3b   :  { %v477_v14 = vld [vmem:[#allocation7 + $0x18] sm:$0xff]   ;;  %v467_v16 = vld [vmem:[#allocation5 + $0x30] sm:$0xff]   ;;  %v479_v17 = vld [vmem:[#allocation7 + $0x20] sm:$0xff]  }
  0x3c   :  { %436 = vmatpush3.bf16.msra.mxu0 %v462_v2  ;;  %v480_v18 = vld [vmem:[#allocation7 + $0x68] sm:$0xff]   ;;  %v468_v19 = vld [vmem:[#allocation5 + $0x38] sm:$0xff]   ;;  %v482_v22 = vld [vmem:[#allocation7 + $0x70] sm:$0xff]   ;;  %p559_p13 = por %p558_p12, %p557_p11 }
  0x3d   :  { %437 = vmatprep.subr.bf16.mxu0 %v585_v0  ;;  %414 = vmatpush3.bf16.msra.mxu1 %v473_v8  ;;  %v481_v20 = vld [vmem:[#allocation7 + $0x28] sm:$0xff]   ;;  %v469_v21 = vld [vmem:[#allocation2] sm:$0xff]   ;;  %v483_v23 = vld [vmem:[#allocation7 + $0x30] sm:$0xff]  }
  0x3e   :  { %415 = vmatprep.subr.bf16.mxu1 %v474_v9  ;;  %v484_v24 = vld [vmem:[#allocation7 + $0x78] sm:$0xff]   ;;  %p560_p0 = pnand %p559_p13, %p553_p10 }
  0x3f   :  { %v485_v25 = vld [vmem:[#allocation7 + $0x38] sm:$0xff]  }
  0x40   :  { %438 = vmatpush3.bf16.msra.mxu0 %v463_v3 }
  0x41   :  { %439 = vmatprep.subr.bf16.mxu0 %v585_v0  ;;  %416 = vmatpush3.bf16.msra.mxu1 %v475_v11 }
  0x42   :  { %417 = vmatprep.subr.bf16.mxu1 %v476_v12 }
  0x44   :  { %440 = vmatpush3.bf16.msra.mxu0 %v464_v4 }
  0x45   :  { %441 = vmatprep.subr.bf16.mxu0 %v585_v0  ;;  %418 = vmatpush3.bf16.msra.mxu1 %v477_v14 }
  0x46   :  { %419 = vmatprep.subr.bf16.mxu1 %v478_v15 }
  0x48   :  { %442 = vmatpush3.bf16.msra.mxu0 %v465_v10 }
  0x49   :  { %443 = vmatprep.subr.bf16.mxu0 %v585_v0  ;;  %420 = vmatpush3.bf16.msra.mxu1 %v479_v17 }
  0x4a   :  { %421 = vmatprep.subr.bf16.mxu1 %v480_v18 }
  0x4c   :  { %444 = vmatpush3.bf16.msra.mxu0 %v466_v13 }
  0x4d   :  { %445 = vmatprep.subr.bf16.mxu0 %v585_v0  ;;  %422 = vmatpush3.bf16.msra.mxu1 %v481_v20 }
  0x4e   :  { %423 = vmatprep.subr.bf16.mxu1 %v482_v22 }
  0x50   :  { %446 = vmatpush3.bf16.msra.mxu0 %v467_v16 }
  0x51   :  { %447 = vmatprep.subr.bf16.mxu0 %v585_v0  ;;  %424 = vmatpush3.bf16.msra.mxu1 %v483_v23 }
  0x52   :  { %425 = vmatprep.subr.bf16.mxu1 %v484_v24 }
  0x54   :  { %448 = vmatpush3.bf16.msra.mxu0 %v468_v19 }
  0x55   :  { %426 = vmatpush3.bf16.msra.mxu1 %v485_v25 }
  0x57   :  { %450 = vmatmul.mubr.bf16.vlgmr.msra.gmra.mrb[0].mxu0 %v469_v21 }
 0x12a   :  { %v163_v26 = vpop.f32.mrb[0].mxu0 }
 0x12b   :  { %v451_v27 = vpop.f32.mrb[1].mxu0 }
 0x12c   :  { %v166_v28 = vpop.f32.mrb[2].mxu0 }
 0x12d   :  { %v452_v29 = vpop.f32.mrb[3].mxu0  ;;  %v170_v30 = vpack.c.bf16 %v166_v28, %v163_v26 }
 0x12f   :  { %331 = vmatprep.mubr.bf16.mxu1 %v170_v30 }
 0x130   :  { %332 = vmatmul.mubr.bf16.vlgmr.msra.gmra.mrb[0].mxu1 %v469_v21 }
 0x203   :  { %v427_v31 = vpop.f32.mrb[0].mxu1 }
 0x204   :  { %v428_v32 = vpop.f32.mrb[1].mxu1 }
 0x205   :  { %v429_v33 = vadd.f32 %v428_v32, %v427_v31  ;;  %v430_v34 = vpop.f32.mrb[2].mxu1 }
 0x206   :  { %v431_v35 = vpop.f32.mrb[3].mxu1 }
 0x207   :  { %v432_v36 = vadd.f32 %v431_v35, %v430_v34 }
 0x209   :  { %v400_v37 = vpack.c.bf16 %v432_v36, %v429_v33 }
 0x20b   :  { %401 = vst [vmem:[#allocation8] sm:$0xff] %v400_v37  }
 0x20c   :  { %563 = shalt.err (!%p560_p0)
}
 0x20d   :  { %s564_s27 = scalar_lea.hbm %s678_s3, 128 }
 0x20e   :  { %p565_p1 = scmp.ne.s32.totalorder %s678_s3, %s564_s27  ;;  %p568_p2 = scmp.lt.u32.totalorder %s564_s27, %s678_s3 }
 0x210   :  { %p570_p3 = pnand %p568_p2, %p565_p1 }
 0x212   :  { %573 = shalt.err (!%p570_p3)
}
 0x213   :  { %361 = dma.vmem_to_hbm [thread:$0]  %s356_s21, 128, %s678_s3, [#allocation4], %s582_s24, %s582_s24, %s583_s25  }
 0x214   :  { %578 = dma.done.wait [#allocation4], 128  }
 0x215   :  { %579 = vsyncadd [#allocation4], 4294967168 }
 0x216   :  { %365 = vsyncpa [#allocation3], 1 }
 0x217   :  { %366 = vsyncpa [#allocation6], 1 }
 0x218   :  { %367 = vsyncpa [#allocation4], 1 }

</bundles_post_ra>
